<compile_context>
chip_gen: v5e
topology: v5e:2x2
jax: 0.10.0
libtpu: 0.0.40
codegen_flags: <defaults>
</compile_context>

<pallas_src>
import functools

import jax
import jax.numpy as jnp
from jax.experimental import pallas as pl
from jax.experimental.pallas import tpu as pltpu


def glmlfb_kernel(x_ref, w_ref, b_ref, o_ref):
    """One batch tile of y = relu(x @ w + b).

    x_ref: [tb, 47] VMEM  (batch rows on sublanes, features on lanes)
    w_ref: [1, 47]  VMEM  (weight row; sublane-broadcast against x)
    b_ref: [1, 1]   SMEM  (bias scalar)
    o_ref: [tb, 1]  VMEM
    """
    prod = x_ref[...] * w_ref[...]                  # VPU, weight broadcast over sublanes
    y = jnp.sum(prod, axis=-1, keepdims=True)       # XLU lane reduce -> [tb, 1]
    o_ref[...] = jnp.maximum(y + b_ref[0, 0], 0.0)  # bias add + F.relu (VPU)


def _pick_block_rows():
    """Default batch tile, sized from per-generation VMEM capacity.

    The x block occupies tb*512 B in VMEM (47 lanes padded to 128) and the
    lane-sparse (tb, 1) out block another tb*512 B; double-buffered that is
    ~2 KiB per row.  16K rows -> ~32 MiB (fine on v5e/v6e's 128 MiB VMEM),
    8K rows -> ~16 MiB (safe on v7x's 64 MiB per TensorCore).
    """
    try:
        vmem_bytes = pltpu.get_tpu_info().vmem_capacity_bytes
    except Exception:
        vmem_bytes = 64 << 20
    return 16384 if vmem_bytes >= (96 << 20) else 8192


@functools.partial(jax.jit, static_argnames=("block_rows",))
def glmlfb_forward(x, w_t, b, *, block_rows=None):
    """x: [B, IN] f32, w_t: [IN, 1] f32, b: [1, 1] f32 -> relu(x @ w_t + b): [B, 1]."""
    B, in_size = x.shape
    assert w_t.shape == (in_size, 1), "GLMLFB uses outputSize=1; VPU-reduce path assumes OUT=1"

    if block_rows is None:
        block_rows = _pick_block_rows()

    # Tile rows: either the full batch (full-array dims are always layout-legal,
    # even when not a multiple of 8) or a multiple-of-8 tile with a ragged last
    # block handled by Pallas' out-of-bounds write masking.
    if B <= block_rows:
        tb = B
    else:
        tb = max(8, (block_rows // 8) * 8)
    grid = (pl.cdiv(B, tb),)

    x = x.astype(jnp.float32)
    w_row = w_t.reshape(1, in_size).astype(jnp.float32)
    b_s = b.reshape(1, 1).astype(jnp.float32)

    # Double-buffered x block + double-buffered (lane-padded) out block.
    vmem_need = 4 * tb * 512 + (2 << 20)
    vmem_limit = int(min(max(vmem_need, 32 << 20), 96 << 20))

    y = pl.pallas_call(
        glmlfb_kernel,
        out_shape=jax.ShapeDtypeStruct((B, 1), jnp.float32),
        grid=grid,
        in_specs=[
            pl.BlockSpec((tb, in_size), lambda i: (i, 0)),        # x tile per grid step
            pl.BlockSpec((1, in_size), lambda i: (0, 0)),         # weights: VMEM-resident
            pl.BlockSpec((1, 1), lambda i: (0, 0),
                         memory_space=pltpu.MemorySpace.SMEM),    # bias scalar
        ],
        out_specs=pl.BlockSpec((tb, 1), lambda i: (i, 0)),
        compiler_params=pltpu.CompilerParams(
            dimension_semantics=("parallel",),                    # 2 TCs on v7x
            vmem_limit_bytes=vmem_limit,
        ),
    )(x, w_row, b_s)
    return y


def init_glmlfb_params(key, in_size=47, out_size=1):
    """Deterministic init mirroring nn.Linear's uniform(-1/sqrt(in), 1/sqrt(in))."""
    kw, kb = jax.random.split(key)
    bound = 1.0 / jnp.sqrt(jnp.float32(in_size))
    # PyTorch stores weight as [out, in]; we keep the transposed [in, out] layout.
    w_t = jax.random.uniform(kw, (in_size, out_size), jnp.float32, -bound, bound)
    b = jax.random.uniform(kb, (1, out_size), jnp.float32, -bound, bound)
    return w_t, b


if __name__ == "__main__":
    key = jax.random.PRNGKey(0)
    k_x, k_p, k_x2 = jax.random.split(key, 3)

    IN_SIZE, OUT_SIZE = 47, 1                 # arch='GLMLF-B7S' -> inSize=47
    w_t, b = init_glmlfb_params(k_p, IN_SIZE, OUT_SIZE)

    # Small canonical case: single grid step, tb == B.
    B = 8
    x = jax.random.normal(k_x, (B, IN_SIZE), jnp.float32)
    y = glmlfb_forward(x, w_t, b)
    jax.block_until_ready(y)
    y_ref = jnp.maximum(x @ w_t + b, 0.0)
    assert y.shape == (B, OUT_SIZE)
    assert jnp.allclose(y, y_ref, atol=1e-5, rtol=1e-5)

    # Multi-step grid with a ragged last block (300 = 2*128 + 44 rows) and
    # parallel dimension semantics; no batch padding copy is made.
    B2 = 300
    x2 = jax.random.normal(k_x2, (B2, IN_SIZE), jnp.float32)
    y2 = glmlfb_forward(x2, w_t, b, block_rows=128)
    jax.block_until_ready(y2)
    y2_ref = jnp.maximum(x2 @ w_t + b, 0.0)
    assert y2.shape == (B2, OUT_SIZE)
    assert jnp.allclose(y2, y2_ref, atol=1e-5, rtol=1e-5)

    # Same batch with the default (large) tile: one full-dim block whose row
    # count (300) is not a multiple of 8 — legal because it equals the array dim.
    y3 = glmlfb_forward(x2, w_t, b)
    jax.block_until_ready(y3)
    assert jnp.allclose(y3, y2_ref, atol=1e-5, rtol=1e-5)

    print("KERNEL_OK")
</pallas_src>

<mosaic_0001>
module attributes {stable_mosaic.version = 11 : i64} {
  func.func @glmlfb_kernel(%arg0: i32, %arg1: memref<8x47xf32, #tpu.memory_space<vmem>>, %arg2: memref<1x47xf32, #tpu.memory_space<vmem>>, %arg3: memref<1x1xf32, #tpu.memory_space<smem>>, %arg4: memref<8x1xf32, #tpu.memory_space<vmem>>) attributes {dimension_semantics = [#tpu.dimension_semantics<parallel>], iteration_bounds = array<i64: 1>, scalar_prefetch = 0 : i64, scratch_operands = 0 : i64, tpu.core_type = #tpu.core_type<tc>, window_params = [{transform_indices = @transform_0, window_bounds = array<i64: 8, 47>}, {pipeline_mode = #tpu.pipeline_mode<synchronous>, transform_indices = @transform_1, window_bounds = array<i64: 1, 47>}, {transform_indices = @transform_2, window_bounds = array<i64: 1, 1>}, {transform_indices = @transform_3, window_bounds = array<i64: 8, 1>}]} {
    %c0 = arith.constant 0 : index
    %c0_0 = arith.constant 0 : index
    %0 = vector.load %arg1[%c0, %c0_0] : memref<8x47xf32, #tpu.memory_space<vmem>>, vector<8x47xf32>
    %c0_1 = arith.constant 0 : index
    %c0_2 = arith.constant 0 : index
    %1 = vector.load %arg2[%c0_1, %c0_2] : memref<1x47xf32, #tpu.memory_space<vmem>>, vector<1x47xf32>
    %2 = vector.broadcast %1 : vector<1x47xf32> to vector<8x47xf32>
    %3 = arith.mulf %0, %2 : vector<8x47xf32>
    %cst = arith.constant dense<0.000000e+00> : vector<8xf32>
    %4 = vector.multi_reduction <add>, %3, %cst [1] : vector<8x47xf32> to vector<8xf32>
    %5 = vector.shape_cast %4 : vector<8xf32> to vector<8x1xf32>
    %c0_3 = arith.constant 0 : index
    %c0_4 = arith.constant 0 : index
    %6 = memref.load %arg3[%c0_3, %c0_4] : memref<1x1xf32, #tpu.memory_space<smem>>
    %7 = vector.broadcast %6 : f32 to vector<8x1xf32>
    %8 = arith.addf %5, %7 : vector<8x1xf32>
    %cst_5 = arith.constant 0.000000e+00 : f32
    %9 = vector.broadcast %cst_5 : f32 to vector<8x1xf32>
    %10 = arith.maximumf %8, %9 : vector<8x1xf32>
    %c0_6 = arith.constant 0 : index
    %c0_7 = arith.constant 0 : index
    %11 = vector.load %arg4[%c0_6, %c0_7] : memref<8x1xf32, #tpu.memory_space<vmem>>, vector<8x1xf32>
    tpu.vector_store %arg4[%c0_6, %c0_7], %10 {strides = array<i32>} : memref<8x1xf32, #tpu.memory_space<vmem>>, vector<8x1xf32>,
    return
  }
  func.func @transform_0(%arg0: i32) -> (i32, i32) {
    %c0_i32 = arith.constant 0 : i32
    %c0_i32_0 = arith.constant 0 : i32
    return %arg0, %c0_i32 : i32, i32
  }
  func.func @transform_1(%arg0: i32) -> (i32, i32) {
    %c0_i32 = arith.constant 0 : i32
    %c0_i32_0 = arith.constant 0 : i32
    %c0_i32_1 = arith.constant 0 : i32
    return %c0_i32, %c0_i32_0 : i32, i32
  }
  func.func @transform_2(%arg0: i32) -> (i32, i32) {
    %c0_i32 = arith.constant 0 : i32
    %c0_i32_0 = arith.constant 0 : i32
    %c0_i32_1 = arith.constant 0 : i32
    return %c0_i32, %c0_i32_0 : i32, i32
  }
  func.func @transform_3(%arg0: i32) -> (i32, i32) {
    %c0_i32 = arith.constant 0 : i32
    %c0_i32_0 = arith.constant 0 : i32
    return %arg0, %c0_i32 : i32, i32
  }
}

</mosaic_0001>

<bundles_post_ra>
// kernel: glmlfb_forward.1
= control target key start
LH: loop header
LB: loop body
LE: loop exit
PB: predicated region body
PF: predicated region fallthrough
CT: control target
= control target key end

     0   :  { %9 = vsyncpa [#allocation4], 0  ;;  %s78_s15 = smov [#allocation3]   ;;  %s111_s0 = inlined_call_operand.hbm [shape: f32[8,47], index: 0, kind: input, shape index: {}]   ;;  %s112_s1 = inlined_call_operand.vmem [shape: f32[1,47], index: 1, kind: input, shape index: {}]   ;;  %s113_s2 = inlined_call_operand.<no memory space> [shape: f32[1,1], index: 2, kind: input, shape index: {}]   ;;  %s114_s3 = inlined_call_operand.vmem [shape: f32[8,1], index: 3, kind: output, shape index: {}]  }
   0x1   :  { %s15_s14 = sshll.u32 %s111_s0, 4  ;;  %s17_s16 = sshll.u32 %s78_s15, 4  ;;  %s16_s14 = int_to_ptr.hbm [resolvable:$true] %s15_s14  ;;  %s18_s16 = int_to_ptr.vmem [resolvable:$true] %s17_s16 }
   0x2   :  { %20 = dma.hbm_to_vmem [thread:$0]  %s16_s14, 128, %s18_s16, [#allocation4]  }
   0x3   :  { %76 = dma.done.wait [#allocation4], 128  }
   0x4   :  { %77 = vsyncadd [#allocation4], 4294967168  ;;  %v29_v0 = vld [vmem:[#allocation3] sm:$0xff]  ;;  %vm35_vm0 = vcmask 384000   ;;  %v40_v4 = vstv %s113_s2  ;;  %vm43_vm1 = vcmask 7168  }
   0x5   :  { %v51_v1 = vld [vmem:[%s112_s1] ss:$0 sm:$0xff] }
   0x6   :  { %v34_v2 = vmul.f32 %v51_v1, %v29_v0 }
   0x8   :  { %v36_v3 = vsel %vm35_vm0, %v34_v2, 0.0 }
   0x9   :  { %37 = vadd.xlane.f32.xlu0 %v36_v3 }
  0x7c   :  { %v38_v5 = vpop.xlane.xlu0 %37 }
  0x7d   :  { %v41_v6 = vadd.f32 %v40_v4, %v38_v5 }
  0x7f   :  { %v42_v7 = vmax.f32 %v41_v6, 0.0 }
  0x81   :  { %44 = vst.msk [vmem:[%s114_s3] sm:$0xff] %vm43_vm1, %v42_v7 }
  0x82   :  { %49 = vsyncpa [#allocation4], 1 }

</bundles_post_ra>
